<compile_context>
chip_gen: v5e
topology: v5e:2x2
jax: 0.10.0
libtpu: 0.0.40
codegen_flags: <defaults>
</compile_context>

<pallas_src>
import functools

import numpy as np

import jax
import jax.numpy as jnp
from jax.experimental import pallas as pl
from jax.experimental.pallas import tpu as pltpu

EPS = 1e-5


# --------------------------------------------------------------------------
# Kernel
# --------------------------------------------------------------------------
def basic_block_kernel(x_ref, su_ref, sd_ref,
                       m1_ref, g1_ref, b1_ref,
                       m2_ref, g2_ref, b2_ref,
                       gsel_ref, gselt_ref,
                       o_ref, *, inv_count):
    x = x_ref[...]          # (R, W*C) f32, lane-dense (residual = same value)
    su = su_ref[...]        # (R, R)  shift "up"  : (su @ a)[r] = a[r-1] (0 at y==0)
    sd = sd_ref[...]        # (R, R)  shift "down": (sd @ a)[r] = a[r+1] (0 at y==H-1)
    gsel = gsel_ref[...]    # (W*C, C) channel-selection (column k -> channel k%C)
    gselt = gselt_ref[...]  # (C, W*C) its transpose (channel -> columns broadcast)

    def conv3x3(a, m_ref):
        # 3x3 "same" conv as 3 lane-dense matmuls; dx taps + x zero-padding are
        # baked into the banded weights, dy taps + y zero-padding into su/sd.
        a_up = jnp.dot(su, a, preferred_element_type=jnp.float32)
        a_dn = jnp.dot(sd, a, preferred_element_type=jnp.float32)
        acc = jnp.dot(a_up, m_ref[0], preferred_element_type=jnp.float32)
        acc = acc + jnp.dot(a, m_ref[1], preferred_element_type=jnp.float32)
        acc = acc + jnp.dot(a_dn, m_ref[2], preferred_element_type=jnp.float32)
        return acc

    def bn_scale_shift(a, g_ref, b_ref):
        # Training-mode BatchNorm, biased batch stats, var = E[x^2] - E[x]^2.
        colsum = jnp.sum(a, axis=0, keepdims=True)        # (1, W*C)
        colsq = jnp.sum(a * a, axis=0, keepdims=True)     # (1, W*C)
        mean = jnp.dot(colsum, gsel,
                       preferred_element_type=jnp.float32) * inv_count   # (1, C)
        ex2 = jnp.dot(colsq, gsel,
                      preferred_element_type=jnp.float32) * inv_count    # (1, C)
        var = ex2 - mean * mean
        scale = g_ref[...] * jax.lax.rsqrt(var + EPS)      # (1, C)
        shift = b_ref[...] - mean * scale                  # (1, C)
        # Broadcast per-channel scale/shift back to the lane-dense column layout.
        scale_cols = jnp.dot(scale, gselt, preferred_element_type=jnp.float32)
        shift_cols = jnp.dot(shift, gselt, preferred_element_type=jnp.float32)
        return scale_cols, shift_cols

    # conv1 -> bn1 -> relu
    acc1 = conv3x3(x, m1_ref)
    s1, t1 = bn_scale_shift(acc1, g1_ref, b1_ref)
    out1 = jnp.maximum(acc1 * s1 + t1, 0.0)

    # conv2 -> bn2 -> (+x) -> relu   (single fused elementwise pass)
    acc2 = conv3x3(out1, m2_ref)
    s2, t2 = bn_scale_shift(acc2, g2_ref, b2_ref)
    o_ref[...] = jnp.maximum(acc2 * s2 + t2 + x, 0.0)


# --------------------------------------------------------------------------
# Host-side weight / constant preparation (layout plumbing, done once)
# --------------------------------------------------------------------------
def _make_banded_weight(wt, w):
    """wt: (3, 3, Cin, Cout) -> banded (3, w*Cin, w*Cout), dx + x-padding folded in."""
    wt = np.asarray(wt, np.float32)
    _, _, cin, cout = wt.shape
    m = np.zeros((3, w * cin, w * cout), np.float32)
    for dyi in range(3):
        for xo in range(w):
            for dxi in range(3):
                xi = xo + (dxi - 1)
                if 0 <= xi < w:
                    m[dyi, xi * cin:(xi + 1) * cin,
                      xo * cout:(xo + 1) * cout] = wt[dyi, dxi]
    return jnp.asarray(m)


def _make_shift_matrices(n, h):
    """0/1 row-shift matrices over r = n*h + y, zero at image boundaries."""
    r_tot = n * h
    su = np.zeros((r_tot, r_tot), np.float32)
    sd = np.zeros((r_tot, r_tot), np.float32)
    for r in range(r_tot):
        y = r % h
        if y >= 1:
            su[r, r - 1] = 1.0
        if y <= h - 2:
            sd[r, r + 1] = 1.0
    return jnp.asarray(su), jnp.asarray(sd)


def _make_channel_selectors(w, c):
    gsel = np.tile(np.eye(c, dtype=np.float32), (w, 1))   # (w*c, c), row k = e_{k%c}
    return jnp.asarray(gsel), jnp.asarray(gsel.T.copy())


# --------------------------------------------------------------------------
# Wrapper
# --------------------------------------------------------------------------
def basic_block_forward(x_nchw, params):
    """x_nchw: (N, C, H, W) float32 (PyTorch layout). params: (w1,g1,b1,w2,g2,b2)."""
    w1, g1, b1, w2, g2, b2 = params
    n, c, h, w = x_nchw.shape
    cout = w1.shape[-1]
    assert c == cout, "downsample=None requires inplanes == planes"

    r_tot, lanes = n * h, w * c

    # NCHW -> NHWC -> lane-dense (N*H, W*C); this is the ONLY activation input.
    x2d = jnp.transpose(x_nchw, (0, 2, 3, 1)).reshape(r_tot, lanes).astype(jnp.float32)

    m1 = _make_banded_weight(w1, w)
    m2 = _make_banded_weight(w2, w)
    su, sd = _make_shift_matrices(n, h)
    gsel, gselt = _make_channel_selectors(w, c)
    g1r, b1r = g1.reshape(1, c).astype(jnp.float32), b1.reshape(1, c).astype(jnp.float32)
    g2r, b2r = g2.reshape(1, c).astype(jnp.float32), b2.reshape(1, c).astype(jnp.float32)

    i2 = lambda i: (0, 0)
    i3 = lambda i: (0, 0, 0)

    kernel = functools.partial(basic_block_kernel, inv_count=1.0 / float(n * h * w))

    out2d = pl.pallas_call(
        kernel,
        out_shape=jax.ShapeDtypeStruct((r_tot, lanes), jnp.float32),
        grid_spec=pltpu.PrefetchScalarGridSpec(
            num_scalar_prefetch=0,
            grid=(1,),
            in_specs=[
                pl.BlockSpec((r_tot, lanes), i2),        # x (also the residual)
                pl.BlockSpec((r_tot, r_tot), i2),        # shift-up matrix
                pl.BlockSpec((r_tot, r_tot), i2),        # shift-down matrix
                pl.BlockSpec((3, lanes, lanes), i3),     # conv1 banded weight
                pl.BlockSpec((1, c), i2),                # bn1 gamma
                pl.BlockSpec((1, c), i2),                # bn1 beta
                pl.BlockSpec((3, lanes, lanes), i3),     # conv2 banded weight
                pl.BlockSpec((1, c), i2),                # bn2 gamma
                pl.BlockSpec((1, c), i2),                # bn2 beta
                pl.BlockSpec((lanes, c), i2),            # channel selector
                pl.BlockSpec((c, lanes), i2),            # channel selector^T
            ],
            out_specs=pl.BlockSpec((r_tot, lanes), i2),
        ),
        compiler_params=pltpu.CompilerParams(
            dimension_semantics=("arbitrary",)),
    )(x2d, su, sd, m1, g1r, b1r, m2, g2r, b2r, gsel, gselt)

    # Lane-dense slab -> NHWC -> NCHW (layout plumbing stays in the wrapper).
    return jnp.transpose(out2d.reshape(n, h, w, c), (0, 3, 1, 2))


# --------------------------------------------------------------------------
# Pure-JAX reference (for in-script correctness check)
# --------------------------------------------------------------------------
def reference_forward(x_nchw, params):
    w1, g1, b1, w2, g2, b2 = params
    x = jnp.transpose(x_nchw, (0, 2, 3, 1)).astype(jnp.float32)

    def conv(a, wt):
        return jax.lax.conv_general_dilated(
            a, wt, window_strides=(1, 1), padding="SAME",
            dimension_numbers=("NHWC", "HWIO", "NHWC"),
            precision=jax.lax.Precision.HIGHEST)

    def bn(a, gamma, beta):
        mean = jnp.mean(a, axis=(0, 1, 2))
        var = jnp.mean((a - mean) ** 2, axis=(0, 1, 2))
        return (a - mean) * jax.lax.rsqrt(var + EPS) * gamma + beta

    out = jnp.maximum(bn(conv(x, w1), g1, b1), 0.0)
    out = bn(conv(out, w2), g2, b2)
    out = jnp.maximum(out + x, 0.0)
    return jnp.transpose(out, (0, 3, 1, 2))


if __name__ == "__main__":
    key = jax.random.PRNGKey(0)
    k_x, k_w1, k_w2, k_g1, k_b1, k_g2, k_b2 = jax.random.split(key, 7)

    # inplanes == planes == 8 (required for residual add with downsample=None);
    # W * C = 16 * 8 = 128 gives a fully lane-dense layout.
    N, C, H, W = 2, 8, 16, 16
    x = jax.random.normal(k_x, (N, C, H, W), jnp.float32)

    w1 = 0.1 * jax.random.normal(k_w1, (3, 3, C, C), jnp.float32)
    w2 = 0.1 * jax.random.normal(k_w2, (3, 3, C, C), jnp.float32)
    g1 = 1.0 + 0.1 * jax.random.normal(k_g1, (C,), jnp.float32)
    b1 = 0.1 * jax.random.normal(k_b1, (C,), jnp.float32)
    g2 = 1.0 + 0.1 * jax.random.normal(k_g2, (C,), jnp.float32)
    b2 = 0.1 * jax.random.normal(k_b2, (C,), jnp.float32)
    params = (w1, g1, b1, w2, g2, b2)

    out = basic_block_forward(x, params)
    jax.block_until_ready(out)

    assert out.shape == (N, C, H, W)
    assert bool(jnp.all(out >= 0.0))          # final ReLU
    ref = reference_forward(x, params)
    max_err = float(jnp.max(jnp.abs(out - ref)))
    assert max_err < 1e-3, f"mismatch vs reference: max abs err = {max_err}"
    print("KERNEL_OK")
</pallas_src>

<mosaic_0001>
module attributes {stable_mosaic.version = 11 : i64} {
  func.func @basic_block_kernel(%arg0: i32, %arg1: memref<32x128xf32, #tpu.memory_space<vmem>>, %arg2: memref<32x32xf32, #tpu.memory_space<vmem>>, %arg3: memref<32x32xf32, #tpu.memory_space<vmem>>, %arg4: memref<3x128x128xf32, #tpu.memory_space<vmem>>, %arg5: memref<1x8xf32, #tpu.memory_space<vmem>>, %arg6: memref<1x8xf32, #tpu.memory_space<vmem>>, %arg7: memref<3x128x128xf32, #tpu.memory_space<vmem>>, %arg8: memref<1x8xf32, #tpu.memory_space<vmem>>, %arg9: memref<1x8xf32, #tpu.memory_space<vmem>>, %arg10: memref<128x8xf32, #tpu.memory_space<vmem>>, %arg11: memref<8x128xf32, #tpu.memory_space<vmem>>, %arg12: memref<32x128xf32, #tpu.memory_space<vmem>>) attributes {dimension_semantics = [#tpu.dimension_semantics<arbitrary>], iteration_bounds = array<i64: 1>, scalar_prefetch = 0 : i64, scratch_operands = 0 : i64, tpu.core_type = #tpu.core_type<tc>, window_params = [{pipeline_mode = #tpu.pipeline_mode<synchronous>, transform_indices = @transform_0, window_bounds = array<i64: 32, 128>}, {pipeline_mode = #tpu.pipeline_mode<synchronous>, transform_indices = @transform_1, window_bounds = array<i64: 32, 32>}, {pipeline_mode = #tpu.pipeline_mode<synchronous>, transform_indices = @transform_2, window_bounds = array<i64: 32, 32>}, {pipeline_mode = #tpu.pipeline_mode<synchronous>, transform_indices = @transform_3, window_bounds = array<i64: 3, 128, 128>}, {pipeline_mode = #tpu.pipeline_mode<synchronous>, transform_indices = @transform_4, window_bounds = array<i64: 1, 8>}, {pipeline_mode = #tpu.pipeline_mode<synchronous>, transform_indices = @transform_5, window_bounds = array<i64: 1, 8>}, {pipeline_mode = #tpu.pipeline_mode<synchronous>, transform_indices = @transform_6, window_bounds = array<i64: 3, 128, 128>}, {pipeline_mode = #tpu.pipeline_mode<synchronous>, transform_indices = @transform_7, window_bounds = array<i64: 1, 8>}, {pipeline_mode = #tpu.pipeline_mode<synchronous>, transform_indices = @transform_8, window_bounds = array<i64: 1, 8>}, {pipeline_mode = #tpu.pipeline_mode<synchronous>, transform_indices = @transform_9, window_bounds = array<i64: 128, 8>}, {pipeline_mode = #tpu.pipeline_mode<synchronous>, transform_indices = @transform_10, window_bounds = array<i64: 8, 128>}, {pipeline_mode = #tpu.pipeline_mode<synchronous>, transform_indices = @transform_11, window_bounds = array<i64: 32, 128>}]} {
    %c0 = arith.constant 0 : index
    %c0_0 = arith.constant 0 : index
    %0 = vector.load %arg1[%c0, %c0_0] : memref<32x128xf32, #tpu.memory_space<vmem>>, vector<32x128xf32>
    %c0_1 = arith.constant 0 : index
    %c0_2 = arith.constant 0 : index
    %1 = vector.load %arg2[%c0_1, %c0_2] : memref<32x32xf32, #tpu.memory_space<vmem>>, vector<32x32xf32>
    %c0_3 = arith.constant 0 : index
    %c0_4 = arith.constant 0 : index
    %2 = vector.load %arg3[%c0_3, %c0_4] : memref<32x32xf32, #tpu.memory_space<vmem>>, vector<32x32xf32>
    %c0_5 = arith.constant 0 : index
    %c0_6 = arith.constant 0 : index
    %3 = vector.load %arg10[%c0_5, %c0_6] : memref<128x8xf32, #tpu.memory_space<vmem>>, vector<128x8xf32>
    %c0_7 = arith.constant 0 : index
    %c0_8 = arith.constant 0 : index
    %4 = vector.load %arg11[%c0_7, %c0_8] : memref<8x128xf32, #tpu.memory_space<vmem>>, vector<8x128xf32>
    %cst = arith.constant dense<0.000000e+00> : vector<32x128xf32>
    %5 = tpu.matmul %1, %0, %cst {dimension_numbers = #tpu.dot_dimension_numbers<[1], [0], [0], [1], [0, 0, 1, 1], [], []>} : vector<32x32xf32>, vector<32x128xf32>, vector<32x128xf32> -> vector<32x128xf32>
    %cst_9 = arith.constant dense<0.000000e+00> : vector<32x128xf32>
    %6 = tpu.matmul %2, %0, %cst_9 {dimension_numbers = #tpu.dot_dimension_numbers<[1], [0], [0], [1], [0, 0, 1, 1], [], []>} : vector<32x32xf32>, vector<32x128xf32>, vector<32x128xf32> -> vector<32x128xf32>
    %c0_10 = arith.constant 0 : index
    %c0_11 = arith.constant 0 : index
    %c0_12 = arith.constant 0 : index
    %7 = vector.load %arg4[%c0_10, %c0_11, %c0_12] : memref<3x128x128xf32, #tpu.memory_space<vmem>>, vector<1x128x128xf32>
    %8 = vector.shape_cast %7 : vector<1x128x128xf32> to vector<128x128xf32>
    %cst_13 = arith.constant dense<0.000000e+00> : vector<32x128xf32>
    %9 = tpu.matmul %5, %8, %cst_13 {dimension_numbers = #tpu.dot_dimension_numbers<[1], [0], [0], [1], [0, 0, 1, 1], [], []>} : vector<32x128xf32>, vector<128x128xf32>, vector<32x128xf32> -> vector<32x128xf32>
    %c1 = arith.constant 1 : index
    %c0_14 = arith.constant 0 : index
    %c0_15 = arith.constant 0 : index
    %10 = vector.load %arg4[%c1, %c0_14, %c0_15] : memref<3x128x128xf32, #tpu.memory_space<vmem>>, vector<1x128x128xf32>
    %11 = vector.shape_cast %10 : vector<1x128x128xf32> to vector<128x128xf32>
    %cst_16 = arith.constant dense<0.000000e+00> : vector<32x128xf32>
    %12 = tpu.matmul %0, %11, %cst_16 {dimension_numbers = #tpu.dot_dimension_numbers<[1], [0], [0], [1], [0, 0, 1, 1], [], []>} : vector<32x128xf32>, vector<128x128xf32>, vector<32x128xf32> -> vector<32x128xf32>
    %13 = arith.addf %9, %12 : vector<32x128xf32>
    %c2 = arith.constant 2 : index
    %c0_17 = arith.constant 0 : index
    %c0_18 = arith.constant 0 : index
    %14 = vector.load %arg4[%c2, %c0_17, %c0_18] : memref<3x128x128xf32, #tpu.memory_space<vmem>>, vector<1x128x128xf32>
    %15 = vector.shape_cast %14 : vector<1x128x128xf32> to vector<128x128xf32>
    %cst_19 = arith.constant dense<0.000000e+00> : vector<32x128xf32>
    %16 = tpu.matmul %6, %15, %cst_19 {dimension_numbers = #tpu.dot_dimension_numbers<[1], [0], [0], [1], [0, 0, 1, 1], [], []>} : vector<32x128xf32>, vector<128x128xf32>, vector<32x128xf32> -> vector<32x128xf32>
    %17 = arith.addf %13, %16 : vector<32x128xf32>
    %cst_20 = arith.constant dense<0.000000e+00> : vector<128xf32>
    %18 = vector.multi_reduction <add>, %17, %cst_20 [0] : vector<32x128xf32> to vector<128xf32>
    %19 = vector.shape_cast %18 : vector<128xf32> to vector<1x128xf32>
    %20 = arith.mulf %17, %17 : vector<32x128xf32>
    %cst_21 = arith.constant dense<0.000000e+00> : vector<128xf32>
    %21 = vector.multi_reduction <add>, %20, %cst_21 [0] : vector<32x128xf32> to vector<128xf32>
    %22 = vector.shape_cast %21 : vector<128xf32> to vector<1x128xf32>
    %cst_22 = arith.constant dense<0.000000e+00> : vector<1x8xf32>
    %23 = tpu.matmul %19, %3, %cst_22 {dimension_numbers = #tpu.dot_dimension_numbers<[1], [0], [0], [1], [0, 0, 1, 1], [], []>} : vector<1x128xf32>, vector<128x8xf32>, vector<1x8xf32> -> vector<1x8xf32>
    %cst_23 = arith.constant 0.001953125 : f32
    %24 = vector.broadcast %cst_23 : f32 to vector<1x8xf32>
    %25 = arith.mulf %23, %24 : vector<1x8xf32>
    %cst_24 = arith.constant dense<0.000000e+00> : vector<1x8xf32>
    %26 = tpu.matmul %22, %3, %cst_24 {dimension_numbers = #tpu.dot_dimension_numbers<[1], [0], [0], [1], [0, 0, 1, 1], [], []>} : vector<1x128xf32>, vector<128x8xf32>, vector<1x8xf32> -> vector<1x8xf32>
    %cst_25 = arith.constant 0.001953125 : f32
    %27 = vector.broadcast %cst_25 : f32 to vector<1x8xf32>
    %28 = arith.mulf %26, %27 : vector<1x8xf32>
    %29 = arith.mulf %25, %25 : vector<1x8xf32>
    %30 = arith.subf %28, %29 : vector<1x8xf32>
    %c0_26 = arith.constant 0 : index
    %c0_27 = arith.constant 0 : index
    %31 = vector.load %arg5[%c0_26, %c0_27] : memref<1x8xf32, #tpu.memory_space<vmem>>, vector<1x8xf32>
    %cst_28 = arith.constant 9.99999974E-6 : f32
    %32 = vector.broadcast %cst_28 : f32 to vector<1x8xf32>
    %33 = arith.addf %30, %32 : vector<1x8xf32>
    %34 = math.rsqrt %33 : vector<1x8xf32>
    %35 = arith.mulf %31, %34 : vector<1x8xf32>
    %c0_29 = arith.constant 0 : index
    %c0_30 = arith.constant 0 : index
    %36 = vector.load %arg6[%c0_29, %c0_30] : memref<1x8xf32, #tpu.memory_space<vmem>>, vector<1x8xf32>
    %37 = arith.mulf %25, %35 : vector<1x8xf32>
    %38 = arith.subf %36, %37 : vector<1x8xf32>
    %cst_31 = arith.constant dense<0.000000e+00> : vector<1x128xf32>
    %39 = tpu.matmul %35, %4, %cst_31 {dimension_numbers = #tpu.dot_dimension_numbers<[1], [0], [0], [1], [0, 0, 1, 1], [], []>} : vector<1x8xf32>, vector<8x128xf32>, vector<1x128xf32> -> vector<1x128xf32>
    %cst_32 = arith.constant dense<0.000000e+00> : vector<1x128xf32>
    %40 = tpu.matmul %38, %4, %cst_32 {dimension_numbers = #tpu.dot_dimension_numbers<[1], [0], [0], [1], [0, 0, 1, 1], [], []>} : vector<1x8xf32>, vector<8x128xf32>, vector<1x128xf32> -> vector<1x128xf32>
    %41 = vector.broadcast %39 : vector<1x128xf32> to vector<32x128xf32>
    %42 = arith.mulf %17, %41 : vector<32x128xf32>
    %43 = vector.broadcast %40 : vector<1x128xf32> to vector<32x128xf32>
    %44 = arith.addf %42, %43 : vector<32x128xf32>
    %cst_33 = arith.constant 0.000000e+00 : f32
    %45 = vector.broadcast %cst_33 : f32 to vector<32x128xf32>
    %46 = arith.maximumf %44, %45 : vector<32x128xf32>
    %cst_34 = arith.constant dense<0.000000e+00> : vector<32x128xf32>
    %47 = tpu.matmul %1, %46, %cst_34 {dimension_numbers = #tpu.dot_dimension_numbers<[1], [0], [0], [1], [0, 0, 1, 1], [], []>} : vector<32x32xf32>, vector<32x128xf32>, vector<32x128xf32> -> vector<32x128xf32>
    %cst_35 = arith.constant dense<0.000000e+00> : vector<32x128xf32>
    %48 = tpu.matmul %2, %46, %cst_35 {dimension_numbers = #tpu.dot_dimension_numbers<[1], [0], [0], [1], [0, 0, 1, 1], [], []>} : vector<32x32xf32>, vector<32x128xf32>, vector<32x128xf32> -> vector<32x128xf32>
    %c0_36 = arith.constant 0 : index
    %c0_37 = arith.constant 0 : index
    %c0_38 = arith.constant 0 : index
    %49 = vector.load %arg7[%c0_36, %c0_37, %c0_38] : memref<3x128x128xf32, #tpu.memory_space<vmem>>, vector<1x128x128xf32>
    %50 = vector.shape_cast %49 : vector<1x128x128xf32> to vector<128x128xf32>
    %cst_39 = arith.constant dense<0.000000e+00> : vector<32x128xf32>
    %51 = tpu.matmul %47, %50, %cst_39 {dimension_numbers = #tpu.dot_dimension_numbers<[1], [0], [0], [1], [0, 0, 1, 1], [], []>} : vector<32x128xf32>, vector<128x128xf32>, vector<32x128xf32> -> vector<32x128xf32>
    %c1_40 = arith.constant 1 : index
    %c0_41 = arith.constant 0 : index
    %c0_42 = arith.constant 0 : index
    %52 = vector.load %arg7[%c1_40, %c0_41, %c0_42] : memref<3x128x128xf32, #tpu.memory_space<vmem>>, vector<1x128x128xf32>
    %53 = vector.shape_cast %52 : vector<1x128x128xf32> to vector<128x128xf32>
    %cst_43 = arith.constant dense<0.000000e+00> : vector<32x128xf32>
    %54 = tpu.matmul %46, %53, %cst_43 {dimension_numbers = #tpu.dot_dimension_numbers<[1], [0], [0], [1], [0, 0, 1, 1], [], []>} : vector<32x128xf32>, vector<128x128xf32>, vector<32x128xf32> -> vector<32x128xf32>
    %55 = arith.addf %51, %54 : vector<32x128xf32>
    %c2_44 = arith.constant 2 : index
    %c0_45 = arith.constant 0 : index
    %c0_46 = arith.constant 0 : index
    %56 = vector.load %arg7[%c2_44, %c0_45, %c0_46] : memref<3x128x128xf32, #tpu.memory_space<vmem>>, vector<1x128x128xf32>
    %57 = vector.shape_cast %56 : vector<1x128x128xf32> to vector<128x128xf32>
    %cst_47 = arith.constant dense<0.000000e+00> : vector<32x128xf32>
    %58 = tpu.matmul %48, %57, %cst_47 {dimension_numbers = #tpu.dot_dimension_numbers<[1], [0], [0], [1], [0, 0, 1, 1], [], []>} : vector<32x128xf32>, vector<128x128xf32>, vector<32x128xf32> -> vector<32x128xf32>
    %59 = arith.addf %55, %58 : vector<32x128xf32>
    %cst_48 = arith.constant dense<0.000000e+00> : vector<128xf32>
    %60 = vector.multi_reduction <add>, %59, %cst_48 [0] : vector<32x128xf32> to vector<128xf32>
    %61 = vector.shape_cast %60 : vector<128xf32> to vector<1x128xf32>
    %62 = arith.mulf %59, %59 : vector<32x128xf32>
    %cst_49 = arith.constant dense<0.000000e+00> : vector<128xf32>
    %63 = vector.multi_reduction <add>, %62, %cst_49 [0] : vector<32x128xf32> to vector<128xf32>
    %64 = vector.shape_cast %63 : vector<128xf32> to vector<1x128xf32>
    %cst_50 = arith.constant dense<0.000000e+00> : vector<1x8xf32>
    %65 = tpu.matmul %61, %3, %cst_50 {dimension_numbers = #tpu.dot_dimension_numbers<[1], [0], [0], [1], [0, 0, 1, 1], [], []>} : vector<1x128xf32>, vector<128x8xf32>, vector<1x8xf32> -> vector<1x8xf32>
    %cst_51 = arith.constant 0.001953125 : f32
    %66 = vector.broadcast %cst_51 : f32 to vector<1x8xf32>
    %67 = arith.mulf %65, %66 : vector<1x8xf32>
    %cst_52 = arith.constant dense<0.000000e+00> : vector<1x8xf32>
    %68 = tpu.matmul %64, %3, %cst_52 {dimension_numbers = #tpu.dot_dimension_numbers<[1], [0], [0], [1], [0, 0, 1, 1], [], []>} : vector<1x128xf32>, vector<128x8xf32>, vector<1x8xf32> -> vector<1x8xf32>
    %cst_53 = arith.constant 0.001953125 : f32
    %69 = vector.broadcast %cst_53 : f32 to vector<1x8xf32>
    %70 = arith.mulf %68, %69 : vector<1x8xf32>
    %71 = arith.mulf %67, %67 : vector<1x8xf32>
    %72 = arith.subf %70, %71 : vector<1x8xf32>
    %c0_54 = arith.constant 0 : index
    %c0_55 = arith.constant 0 : index
    %73 = vector.load %arg8[%c0_54, %c0_55] : memref<1x8xf32, #tpu.memory_space<vmem>>, vector<1x8xf32>
    %cst_56 = arith.constant 9.99999974E-6 : f32
    %74 = vector.broadcast %cst_56 : f32 to vector<1x8xf32>
    %75 = arith.addf %72, %74 : vector<1x8xf32>
    %76 = math.rsqrt %75 : vector<1x8xf32>
    %77 = arith.mulf %73, %76 : vector<1x8xf32>
    %c0_57 = arith.constant 0 : index
    %c0_58 = arith.constant 0 : index
    %78 = vector.load %arg9[%c0_57, %c0_58] : memref<1x8xf32, #tpu.memory_space<vmem>>, vector<1x8xf32>
    %79 = arith.mulf %67, %77 : vector<1x8xf32>
    %80 = arith.subf %78, %79 : vector<1x8xf32>
    %cst_59 = arith.constant dense<0.000000e+00> : vector<1x128xf32>
    %81 = tpu.matmul %77, %4, %cst_59 {dimension_numbers = #tpu.dot_dimension_numbers<[1], [0], [0], [1], [0, 0, 1, 1], [], []>} : vector<1x8xf32>, vector<8x128xf32>, vector<1x128xf32> -> vector<1x128xf32>
    %cst_60 = arith.constant dense<0.000000e+00> : vector<1x128xf32>
    %82 = tpu.matmul %80, %4, %cst_60 {dimension_numbers = #tpu.dot_dimension_numbers<[1], [0], [0], [1], [0, 0, 1, 1], [], []>} : vector<1x8xf32>, vector<8x128xf32>, vector<1x128xf32> -> vector<1x128xf32>
    %83 = vector.broadcast %81 : vector<1x128xf32> to vector<32x128xf32>
    %84 = arith.mulf %59, %83 : vector<32x128xf32>
    %85 = vector.broadcast %82 : vector<1x128xf32> to vector<32x128xf32>
    %86 = arith.addf %84, %85 : vector<32x128xf32>
    %87 = arith.addf %86, %0 : vector<32x128xf32>
    %cst_61 = arith.constant 0.000000e+00 : f32
    %88 = vector.broadcast %cst_61 : f32 to vector<32x128xf32>
    %89 = arith.maximumf %87, %88 : vector<32x128xf32>
    %c0_62 = arith.constant 0 : index
    %c0_63 = arith.constant 0 : index
    %90 = vector.load %arg12[%c0_62, %c0_63] : memref<32x128xf32, #tpu.memory_space<vmem>>, vector<32x128xf32>
    tpu.vector_store %arg12[%c0_62, %c0_63], %89 {strides = array<i32>} : memref<32x128xf32, #tpu.memory_space<vmem>>, vector<32x128xf32>,
    return
  }
  func.func @transform_0(%arg0: i32) -> (i32, i32) {
    %c0_i32 = arith.constant 0 : i32
    %c0_i32_0 = arith.constant 0 : i32
    %c0_i32_1 = arith.constant 0 : i32
    return %c0_i32, %c0_i32_0 : i32, i32
  }
  func.func @transform_1(%arg0: i32) -> (i32, i32) {
    %c0_i32 = arith.constant 0 : i32
    %c0_i32_0 = arith.constant 0 : i32
    %c0_i32_1 = arith.constant 0 : i32
    return %c0_i32, %c0_i32_0 : i32, i32
  }
  func.func @transform_2(%arg0: i32) -> (i32, i32) {
    %c0_i32 = arith.constant 0 : i32
    %c0_i32_0 = arith.constant 0 : i32
    %c0_i32_1 = arith.constant 0 : i32
    return %c0_i32, %c0_i32_0 : i32, i32
  }
  func.func @transform_3(%arg0: i32) -> (i32, i32, i32) {
    %c0_i32 = arith.constant 0 : i32
    %c0_i32_0 = arith.constant 0 : i32
    %c0_i32_1 = arith.constant 0 : i32
    %c0_i32_2 = arith.constant 0 : i32
    return %c0_i32, %c0_i32_0, %c0_i32_1 : i32, i32, i32
  }
  func.func @transform_4(%arg0: i32) -> (i32, i32) {
    %c0_i32 = arith.constant 0 : i32
    %c0_i32_0 = arith.constant 0 : i32
    %c0_i32_1 = arith.constant 0 : i32
    return %c0_i32, %c0_i32_0 : i32, i32
  }
  func.func @transform_5(%arg0: i32) -> (i32, i32) {
    %c0_i32 = arith.constant 0 : i32
    %c0_i32_0 = arith.constant 0 : i32
    %c0_i32_1 = arith.constant 0 : i32
    return %c0_i32, %c0_i32_0 : i32, i32
  }
  func.func @transform_6(%arg0: i32) -> (i32, i32, i32) {
    %c0_i32 = arith.constant 0 : i32
    %c0_i32_0 = arith.constant 0 : i32
    %c0_i32_1 = arith.constant 0 : i32
    %c0_i32_2 = arith.constant 0 : i32
    return %c0_i32, %c0_i32_0, %c0_i32_1 : i32, i32, i32
  }
  func.func @transform_7(%arg0: i32) -> (i32, i32) {
    %c0_i32 = arith.constant 0 : i32
    %c0_i32_0 = arith.constant 0 : i32
    %c0_i32_1 = arith.constant 0 : i32
    return %c0_i32, %c0_i32_0 : i32, i32
  }
  func.func @transform_8(%arg0: i32) -> (i32, i32) {
    %c0_i32 = arith.constant 0 : i32
    %c0_i32_0 = arith.constant 0 : i32
    %c0_i32_1 = arith.constant 0 : i32
    return %c0_i32, %c0_i32_0 : i32, i32
  }
  func.func @transform_9(%arg0: i32) -> (i32, i32) {
    %c0_i32 = arith.constant 0 : i32
    %c0_i32_0 = arith.constant 0 : i32
    %c0_i32_1 = arith.constant 0 : i32
    return %c0_i32, %c0_i32_0 : i32, i32
  }
  func.func @transform_10(%arg0: i32) -> (i32, i32) {
    %c0_i32 = arith.constant 0 : i32
    %c0_i32_0 = arith.constant 0 : i32
    %c0_i32_1 = arith.constant 0 : i32
    return %c0_i32, %c0_i32_0 : i32, i32
  }
  func.func @transform_11(%arg0: i32) -> (i32, i32) {
    %c0_i32 = arith.constant 0 : i32
    %c0_i32_0 = arith.constant 0 : i32
    %c0_i32_1 = arith.constant 0 : i32
    return %c0_i32, %c0_i32_0 : i32, i32
  }
}

</mosaic_0001>

<bundles_post_ra>
// kernel: tpu_custom_call.1
= control target key start
LH: loop header
LB: loop body
LE: loop exit
PB: predicated region body
PF: predicated region fallthrough
CT: control target
= control target key end

     0   :  { %16 = vsyncpa [#allocation3], 0  ;;  %s1344_s0 = inlined_call_operand.vmem [shape: f32[32,128], index: 0, kind: input, shape index: {}]   ;;  %s1345_s1 = inlined_call_operand.vmem [shape: f32[32,32], index: 1, kind: input, shape index: {}]   ;;  %s1346_s2 = inlined_call_operand.vmem [shape: f32[32,32], index: 2, kind: input, shape index: {}]   ;;  %s1347_s3 = inlined_call_operand.hbm [shape: f32[3,128,128], index: 3, kind: input, shape index: {}]   ;;  %s1348_s4 = inlined_call_operand.vmem [shape: f32[1,8], index: 4, kind: input, shape index: {}]   ;;  %s1349_s5 = inlined_call_operand.vmem [shape: f32[1,8], index: 5, kind: input, shape index: {}]   ;;  %s1350_s6 = inlined_call_operand.hbm [shape: f32[3,128,128], index: 6, kind: input, shape index: {}]   ;;  %s1351_s7 = inlined_call_operand.vmem [shape: f32[1,8], index: 7, kind: input, shape index: {}]   ;;  %s1352_s8 = inlined_call_operand.vmem [shape: f32[1,8], index: 8, kind: input, shape index: {}]   ;;  %s1353_s9 = inlined_call_operand.vmem [shape: f32[128,8], index: 9, kind: input, shape index: {}]   ;;  %s1354_s10 = inlined_call_operand.vmem [shape: f32[8,128], index: 10, kind: input, shape index: {}]   ;;  %s1355_s11 = inlined_call_operand.hbm [shape: f32[32,128], index: 11, kind: output, shape index: {}]  }
   0x1   :  { %17 = vsyncpa [#allocation6], 0 }
   0x2   :  { %18 = vsyncpa [#allocation4], 0  ;;  %s29_s19 = sshll.u32 %s1347_s3, 4  ;;  %s947_s20 = smov [#allocation2]   ;;  %s30_s19 = int_to_ptr.hbm [resolvable:$true] %s29_s19 }
   0x3   :  { %s31_s21 = sshll.u32 %s947_s20, 4  ;;  %s46_s24 = sshll.u32 %s1350_s6, 4  ;;  %s32_s21 = int_to_ptr.vmem [resolvable:$true] %s31_s21  ;;  %s47_s24 = int_to_ptr.hbm [resolvable:$true] %s46_s24 }
   0x4   :  { %s948_s25 = smov 128   ;;  %s949_s26 = smov 8  }
   0x5   :  { %37 = dma.hbm_to_vmem [thread:$0]  %s30_s19, 6144, %s32_s21, [#allocation3], %s948_s25, %s948_s25, %s949_s26  }
   0x6   :  { %s950_s27 = smov [#allocation5]  }
   0x7   :  { %s48_s28 = sshll.u32 %s950_s27, 4  ;;  %s49_s28 = int_to_ptr.vmem [resolvable:$true] %s48_s28 }
   0x8   :  { %54 = dma.hbm_to_vmem [thread:$0]  %s47_s24, 6144, %s49_s28, [#allocation6], %s948_s25, %s948_s25, %s949_s26  }
   0x9   :  { %941 = dma.done.wait [#allocation3], 6144  }
   0xa   :  { %942 = vsyncadd [#allocation3], 4294961152 }
   0xb   :  { %943 = dma.done.wait [#allocation6], 6144  }
   0xc   :  { %944 = vsyncadd [#allocation6], 4294961152  ;;  %v1027_v0 = vld [vmem:[%s1344_s0 + $0x18] sm:$0xff]  ;;  %v1032_v1 = vld [vmem:[%s1344_s0 + $0x10] sm:$0xff]  ;;  %vm100_vm0 = vcmask 261120   ;;  %vm406_vm4 = vcmask 64512  }
   0xd   :  { %125 = vmatpush.msra.mxu0 %v1027_v0  ;;  %166 = vmatpush.msra.mxu3 %v1027_v0  ;;  %v1039_v2 = vld [vmem:[%s1344_s0 + $0x8] sm:$0xff]  ;;  %v1046_v3 = vld [vmem:[%s1344_s0] sm:$0xff]  ;;  %v215_v4 = vld [vmem:[#allocation2 + $0xf8] sm:$0xff]  ;;  %s951_s13 = smov [#allocation7]   ;;  %s822_s17 = sshll.u32 %s1355_s11, 4  ;;  %s823_s17 = int_to_ptr.hbm [resolvable:$true] %s822_s17 }
   0xe   :  { %v1053_v5 = vld [vmem:[%s1345_s1] sm:$0xff]  ;;  %216 = vmatpush.msra.mxu2 %v215_v4  ;;  %v198_v7 = vld [vmem:[#allocation2 + $0x78] sm:$0xff]  ;;  %v214_v8 = vld [vmem:[#allocation2 + $0xf0] sm:$0xff]  ;;  %s820_s14 = sshll.u32 %s951_s13, 4  ;;  %s821_s14 = int_to_ptr.vmem [resolvable:$true] %s820_s14 }
   0xf   :  { %126 = vmatpush.msra.mxu0 %v1032_v1  ;;  %167 = vmatpush.msra.mxu3 %v1032_v1  ;;  %v1058_v6 = vld [vmem:[%s1346_s2] sm:$0xff]  ;;  %v290_v9 = vld [vmem:[#allocation2 + $0x178] sm:$0xff]  ;;  %v197_v10 = vld [vmem:[#allocation2 + $0x70] sm:$0xff] }
  0x10   :  { %v213_v11 = vld [vmem:[#allocation2 + $0xe8] sm:$0xff]  ;;  %217 = vmatpush.msra.mxu2 %v214_v8  ;;  %v289_v12 = vld [vmem:[#allocation2 + $0x170] sm:$0xff]  ;;  %v212_v14 = vld [vmem:[#allocation2 + $0xe0] sm:$0xff] }
  0x11   :  { %127 = vmatpush.msra.mxu0 %v1039_v2  ;;  %168 = vmatpush.msra.mxu3 %v1039_v2  ;;  %v196_v13 = vld [vmem:[#allocation2 + $0x68] sm:$0xff]  ;;  %v195_v16 = vld [vmem:[#allocation2 + $0x60] sm:$0xff]  ;;  %v211_v17 = vld [vmem:[#allocation2 + $0xd8] sm:$0xff] }
  0x12   :  { %218 = vmatpush.msra.mxu2 %v213_v11  ;;  %v288_v15 = vld [vmem:[#allocation2 + $0x168] sm:$0xff]  ;;  %v194_v20 = vld [vmem:[#allocation2 + $0x58] sm:$0xff]  ;;  %v210_v21 = vld [vmem:[#allocation2 + $0xd0] sm:$0xff] }
  0x13   :  { %128 = vmatpush.msra.mxu0 %v1046_v3  ;;  %169 = vmatpush.msra.mxu3 %v1046_v3  ;;  %v1069_v18 = vld [vmem:[%s1345_s1 + $0x8] sm:$0xff]  ;;  %v287_v22 = vld [vmem:[#allocation2 + $0x160] sm:$0xff]  ;;  %v193_v23 = vld [vmem:[#allocation2 + $0x50] sm:$0xff] }
  0x14   :  { %836 = vmatmul.msk.f32.vlgmr.msra.gmra.mxu0 %vm100_vm0, %v1053_v5  ;;  %840 = vmatmul.msk.f32.vlgmr.msra.gmra.mxu3 %vm100_vm0, %v1058_v6  ;;  %v1074_v19 = vld [vmem:[%s1346_s2 + $0x8] sm:$0xff]  ;;  %v286_v25 = vld [vmem:[#allocation2 + $0x158] sm:$0xff]  ;;  %v208_v27 = vld [vmem:[#allocation2 + $0xc0] sm:$0xff] }
  0x15   :  { %245 = vmatpush.msrb.mxu3 %v198_v7  ;;  %291 = vmatpush.msrb.mxu0 %v290_v9  ;;  %v209_v24 = vld [vmem:[#allocation2 + $0xc8] sm:$0xff]  ;;  %v285_v28 = vld [vmem:[#allocation2 + $0x150] sm:$0xff]  ;;  %v191_v29 = vld [vmem:[#allocation2 + $0x40] sm:$0xff] }
  0x16   :  { %219 = vmatpush.msra.mxu2 %v212_v14  ;;  %v192_v26 = vld [vmem:[#allocation2 + $0x48] sm:$0xff]  ;;  %v207_v30 = vld [vmem:[#allocation2 + $0xb8] sm:$0xff]  ;;  %v1083_v31 = vld [vmem:[%s1345_s1 + $0x10] sm:$0xff] }
  0x17   :  { %246 = vmatpush.msrb.mxu3 %v197_v10  ;;  %292 = vmatpush.msrb.mxu0 %v289_v12  ;;  %v1088_v32 = vld [vmem:[%s1346_s2 + $0x10] sm:$0xff]  ;;  %v190_v33 = vld [vmem:[#allocation2 + $0x38] sm:$0xff]  ;;  %v284_v35 = vld [vmem:[#allocation2 + $0x148] sm:$0xff] }
  0x18   :  { %220 = vmatpush.msra.mxu2 %v211_v17  ;;  %v206_v34 = vld [vmem:[#allocation2 + $0xb0] sm:$0xff]  ;;  %v205_v37 = vld [vmem:[#allocation2 + $0xa8] sm:$0xff]  ;;  %v283_v38 = vld [vmem:[#allocation2 + $0x140] sm:$0xff] }
  0x19   :  { %247 = vmatpush.msrb.mxu3 %v196_v13  ;;  %293 = vmatpush.msrb.mxu0 %v288_v15  ;;  %v189_v36 = vld [vmem:[#allocation2 + $0x30] sm:$0xff]  ;;  %v188_v39 = vld [vmem:[#allocation2 + $0x28] sm:$0xff]  ;;  %v204_v40 = vld [vmem:[#allocation2 + $0xa0] sm:$0xff] }
  0x1a   :  { %221 = vmatpush.msra.mxu2 %v210_v21  ;;  %v282_v41 = vld [vmem:[#allocation2 + $0x138] sm:$0xff]  ;;  %v187_v42 = vld [vmem:[#allocation2 + $0x20] sm:$0xff]  ;;  %v202_v47 = vld [vmem:[#allocation2 + $0x90] sm:$0xff] }
  0x1b   :  { %248 = vmatpush.msrb.mxu3 %v195_v16  ;;  %294 = vmatpush.msrb.mxu0 %v287_v22  ;;  %v203_v43 = vld [vmem:[#allocation2 + $0x98] sm:$0xff]  ;;  %v281_v48 = vld [vmem:[#allocation2 + $0x130] sm:$0xff]  ;;  %v201_v50 = vld [vmem:[#allocation2 + $0x88] sm:$0xff] }
  0x1c   :  { %837 = vmatmul.msk.f32.gmra.mxu0 %vm100_vm0, %v1069_v18  ;;  %841 = vmatmul.msk.f32.gmra.mxu3 %vm100_vm0, %v1074_v19  ;;  %v1097_v44 = vld [vmem:[%s1345_s1 + $0x18] sm:$0xff]  ;;  %v185_v49 = vld [vmem:[#allocation2 + $0x10] sm:$0xff]  ;;  %v280_v51 = vld [vmem:[#allocation2 + $0x128] sm:$0xff] }
  0x1d   :  { %249 = vmatpush.msrb.mxu3 %v194_v20  ;;  %222 = vmatpush.msra.mxu2 %v209_v24  ;;  %v1102_v45 = vld [vmem:[%s1346_s2 + $0x18] sm:$0xff]  ;;  %v184_v52 = vld [vmem:[#allocation2 + $0x8] sm:$0xff]  ;;  %v200_v53 = vld [vmem:[#allocation2 + $0x80] sm:$0xff] }
  0x1e   :  { %295 = vmatpush.msrb.mxu0 %v286_v25  ;;  %v186_v46 = vld [vmem:[#allocation2 + $0x18] sm:$0xff]  ;;  %v183_v54 = vld [vmem:[#allocation2] sm:$0xff]  ;;  %v277_v57 = vld [vmem:[#allocation2 + $0x110] sm:$0xff] }
  0x1f   :  { %250 = vmatpush.msrb.mxu3 %v193_v23  ;;  %223 = vmatpush.msra.mxu2 %v208_v27  ;;  %v279_v55 = vld [vmem:[#allocation2 + $0x120] sm:$0xff]  ;;  %v278_v56 = vld [vmem:[#allocation2 + $0x118] sm:$0xff]  ;;  %v276_v58 = vld [vmem:[#allocation2 + $0x108] sm:$0xff] }
  0x20   :  { %296 = vmatpush.msrb.mxu0 %v285_v28  ;;  %v275_v59 = vld [vmem:[#allocation2 + $0x100] sm:$0xff]  ;;  %v1143_v10 = vld [vmem:[%s1353_s9 + $0x58] sm:$0xff]  ;;  %v1150_v11 = vld [vmem:[%s1353_s9 + $0x50] sm:$0xff] }
  0x21   :  { %251 = vmatpush.msrb.mxu3 %v192_v26  ;;  %224 = vmatpush.msra.mxu2 %v207_v30  ;;  %v1136_v9 = vld [vmem:[%s1353_s9 + $0x60] sm:$0xff]  ;;  %v1157_v12 = vld [vmem:[%s1353_s9 + $0x48] sm:$0xff]  ;;  %v1171_v15 = vld [vmem:[%s1353_s9 + $0x38] sm:$0xff] }
  0x22   :  { %297 = vmatpush.msrb.mxu0 %v284_v35  ;;  %v1164_v14 = vld [vmem:[%s1353_s9 + $0x40] sm:$0xff]  ;;  %v1178_v16 = vld [vmem:[%s1353_s9 + $0x30] sm:$0xff]  ;;  %v1185_v17 = vld [vmem:[%s1353_s9 + $0x28] sm:$0xff] }
  0x23   :  { %252 = vmatpush.msrb.mxu3 %v191_v29  ;;  %225 = vmatpush.msra.mxu2 %v206_v34  ;;  %v1192_v22 = vld [vmem:[%s1353_s9 + $0x20] sm:$0xff]  ;;  %v1197_v23 = vld [vmem:[%s1353_s9 + $0x18] sm:$0xff]  ;;  %v1204_v25 = vld [vmem:[%s1353_s9 + $0x10] sm:$0xff] }
  0x24   :  { %838 = vmatmul.msk.f32.gmra.mxu0 %vm100_vm0, %v1083_v31  ;;  %842 = vmatmul.msk.f32.gmra.mxu3 %vm100_vm0, %v1088_v32  ;;  %v1211_v26 = vld [vmem:[%s1353_s9 + $0x8] sm:$0xff]  ;;  %v1218_v27 = vld [vmem:[%s1353_s9] sm:$0xff] }
  0x25   :  { %253 = vmatpush.msrb.mxu3 %v190_v33  ;;  %226 = vmatpush.msra.mxu2 %v205_v37 }
  0x26   :  { %298 = vmatpush.msrb.mxu0 %v283_v38 }
  0x27   :  { %254 = vmatpush.msrb.mxu3 %v189_v36  ;;  %227 = vmatpush.msra.mxu2 %v204_v40 }
  0x28   :  { %299 = vmatpush.msrb.mxu0 %v282_v41 }
  0x29   :  { %255 = vmatpush.msrb.mxu3 %v188_v39  ;;  %228 = vmatpush.msra.mxu2 %v203_v43 }
  0x2a   :  { %300 = vmatpush.msrb.mxu0 %v281_v48 }
  0x2b   :  { %256 = vmatpush.msrb.mxu3 %v187_v42  ;;  %229 = vmatpush.msra.mxu2 %v202_v47 }
  0x2c   :  { %839 = vmatmul.msk.f32.gmra.mxu0 %vm100_vm0, %v1097_v44  ;;  %843 = vmatmul.msk.f32.gmra.mxu3 %vm100_vm0, %v1102_v45 }
  0x2d   :  { %257 = vmatpush.msrb.mxu3 %v186_v46  ;;  %230 = vmatpush.msra.mxu2 %v201_v50 }
  0x2e   :  { %301 = vmatpush.msrb.mxu0 %v280_v51 }
  0x2f   :  { %258 = vmatpush.msrb.mxu3 %v185_v49  ;;  %231 = vmatpush.msra.mxu2 %v200_v53 }
  0x30   :  { %302 = vmatpush.msrb.mxu0 %v279_v55  ;;  %232 = vmatmul.f32.vlgmr.msra.gmra.mxu2 %v1046_v3 }
  0x31   :  { %259 = vmatpush.msrb.mxu3 %v184_v52 }
  0x32   :  { %303 = vmatpush.msrb.mxu0 %v278_v56 }
  0x33   :  { %260 = vmatpush.msrb.mxu3 %v183_v54 }
  0x34   :  { %304 = vmatpush.msrb.mxu0 %v277_v57 }
  0x36   :  { %305 = vmatpush.msrb.mxu0 %v276_v58 }
  0x38   :  { %306 = vmatpush.msrb.mxu0 %v275_v59  ;;  %235 = vmatmul.f32.gmra.mxu2 %v1039_v2  ;;  %v1129_v2 = vld [vmem:[%s1353_s9 + $0x68] sm:$0xff] }
  0x40   :  { %238 = vmatmul.f32.gmra.mxu2 %v1032_v1  ;;  %v1122_v1 = vld [vmem:[%s1353_s9 + $0x70] sm:$0xff] }
  0x48   :  { %241 = vmatmul.f32.gmra.mxu2 %v1027_v0  ;;  %v1115_v0 = vld [vmem:[%s1353_s9 + $0x78] sm:$0xff] }
  0x49   :  { %346 = vmatpush.msra.mxu1 %v1115_v0  ;;  %367 = vmatpush.msrb.mxu2 %v1115_v0 }
  0x4b   :  { %347 = vmatpush.msra.mxu1 %v1122_v1  ;;  %368 = vmatpush.msrb.mxu2 %v1122_v1 }
  0x4d   :  { %348 = vmatpush.msra.mxu1 %v1129_v2  ;;  %369 = vmatpush.msrb.mxu2 %v1129_v2 }
  0x4f   :  { %349 = vmatpush.msra.mxu1 %v1136_v9  ;;  %370 = vmatpush.msrb.mxu2 %v1136_v9 }
  0x51   :  { %350 = vmatpush.msra.mxu1 %v1143_v10  ;;  %371 = vmatpush.msrb.mxu2 %v1143_v10 }
  0x53   :  { %351 = vmatpush.msra.mxu1 %v1150_v11  ;;  %372 = vmatpush.msrb.mxu2 %v1150_v11 }
  0x55   :  { %352 = vmatpush.msra.mxu1 %v1157_v12  ;;  %373 = vmatpush.msrb.mxu2 %v1157_v12 }
  0x57   :  { %353 = vmatpush.msra.mxu1 %v1164_v14  ;;  %374 = vmatpush.msrb.mxu2 %v1164_v14 }
  0x59   :  { %354 = vmatpush.msra.mxu1 %v1171_v15  ;;  %375 = vmatpush.msrb.mxu2 %v1171_v15 }
  0x5b   :  { %355 = vmatpush.msra.mxu1 %v1178_v16  ;;  %376 = vmatpush.msrb.mxu2 %v1178_v16 }
  0x5d   :  { %356 = vmatpush.msra.mxu1 %v1185_v17  ;;  %377 = vmatpush.msrb.mxu2 %v1185_v17 }
  0x5f   :  { %357 = vmatpush.msra.mxu1 %v1192_v22  ;;  %378 = vmatpush.msrb.mxu2 %v1192_v22 }
  0x61   :  { %358 = vmatpush.msra.mxu1 %v1197_v23  ;;  %379 = vmatpush.msrb.mxu2 %v1197_v23 }
  0x63   :  { %359 = vmatpush.msra.mxu1 %v1204_v25  ;;  %380 = vmatpush.msrb.mxu2 %v1204_v25 }
  0x65   :  { %360 = vmatpush.msra.mxu1 %v1211_v26  ;;  %381 = vmatpush.msrb.mxu2 %v1211_v26 }
  0x67   :  { %361 = vmatpush.msra.mxu1 %v1218_v27  ;;  %382 = vmatpush.msrb.mxu2 %v1218_v27 }
  0x91   :  { %v130_v60 = vpop.f32.mrf.mxu0 }
  0x92   :  { %261 = vmatmul.f32.vlgmr.msrb.gmra.mxu3 %v130_v60 }
  0x97   :  { %v171_v61 = vpop.f32.mrf.mxu3 }
  0x98   :  { %307 = vmatmul.f32.vlgmr.msrb.gmra.mxu0 %v171_v61 }
  0x99   :  { %v133_v62 = vpop.f32.mrf.mxu0 }
  0x9a   :  { %264 = vmatmul.f32.gmra.mxu3 %v133_v62 }
  0x9f   :  { %v174_v63 = vpop.f32.mrf.mxu3 }
  0xa0   :  { %310 = vmatmul.f32.gmra.mxu0 %v174_v63 }
  0xa1   :  { %v136_v3 = vpop.f32.mrf.mxu0 }
  0xa2   :  { %267 = vmatmul.f32.gmra.mxu3 %v136_v3 }
  0xa7   :  { %v177_v4 = vpop.f32.mrf.mxu3 }
  0xa8   :  { %313 = vmatmul.f32.gmra.mxu0 %v177_v4 }
  0xa9   :  { %v139_v7 = vpop.f32.mrf.mxu0 }
  0xaa   :  { %270 = vmatmul.f32.gmra.mxu3 %v139_v7 }
  0xaf   :  { %v180_v8 = vpop.f32.mrf.mxu3 }
  0xb0   :  { %316 = vmatmul.f32.gmra.mxu0 %v180_v8 }
  0xb3   :  { %v233_v13 = vpop.f32.mrf.mxu2 }
  0xbb   :  { %v236_v24 = vpop.f32.mrf.mxu2 }
  0xc3   :  { %v239_v30 = vpop.f32.mrf.mxu2 }
  0xcb   :  { %v242_v41 = vpop.f32.mrf.mxu2 }
 0x115   :  { %v262_v20 = vpop.f32.mrf.mxu3  ;;  %v308_v21 = vpop.f32.mrf.mxu0 }
 0x116   :  { %v263_v36 = vadd.f32 %v262_v20, %v233_v13 }
 0x118   :  { %v1226_v39 = vadd.f32 %v308_v21, %v263_v36  ;;  %v1247_v21 = vld [vmem:[%s1354_s10] sm:$0xff]  ;;  %v556_v36 = vld [vmem:[#allocation5 + $0xf0] sm:$0xff] }
 0x119   :  { %425 = vmatpush.msrb.mxu1 %v1247_v21 }
 0x11a   :  { %v333_v47 = vmul.f32 %v1226_v39, %v1226_v39 }
 0x11d   :  { %v265_v28 = vpop.f32.mrf.mxu3  ;;  %v311_v29 = vpop.f32.mrf.mxu0 }
 0x11e   :  { %v266_v33 = vadd.f32 %v265_v28, %v236_v24 }
 0x120   :  { %v1224_v38 = vadd.f32 %v311_v29, %v266_v33 }
 0x122   :  { %v334_v42 = vmul.f32 %v1224_v38, %v1224_v38  ;;  %v324_v48 = vadd.f32 %v1224_v38, %v1226_v39 }
 0x124   :  { %v337_v51 = vadd.f32 %v334_v42, %v333_v47  ;;  %v554_v42 = vld [vmem:[#allocation5 + $0xe0] sm:$0xff] }
 0x125   :  { %v268_v34 = vpop.f32.mrf.mxu3  ;;  %v314_v35 = vpop.f32.mrf.mxu0 }
 0x126   :  { %v269_v37 = vadd.f32 %v268_v34, %v239_v30 }
 0x128   :  { %v1228_v40 = vadd.f32 %v314_v35, %v269_v37  ;;  %v557_v35 = vld [vmem:[#allocation5 + $0xf8] sm:$0xff] }
 0x129   :  { %558 = vmatpush.msra.mxu0 %v557_v35 }
 0x12a   :  { %v335_v49 = vmul.f32 %v1228_v40, %v1228_v40  ;;  %v325_v52 = vadd.f32 %v324_v48, %v1228_v40  ;;  %v551_v48 = vld [vmem:[#allocation5 + $0xc8] sm:$0xff] }
 0x12b   :  { %559 = vmatpush.msra.mxu0 %v556_v36 }
 0x12c   :  { %v338_v54 = vadd.f32 %v337_v51, %v335_v49 }
 0x12d   :  { %v271_v43 = vpop.f32.mrf.mxu3  ;;  %v317_v46 = vpop.f32.mrf.mxu0 }
 0x12e   :  { %v272_v50 = vadd.f32 %v271_v43, %v242_v41  ;;  %v555_v41 = vld [vmem:[#allocation5 + $0xe8] sm:$0xff]  ;;  %v553_v43 = vld [vmem:[#allocation5 + $0xd8] sm:$0xff] }
 0x12f   :  { %560 = vmatpush.msra.mxu0 %v555_v41 }
 0x130   :  { %v1239_v53 = vadd.f32 %v317_v46, %v272_v50  ;;  %v552_v46 = vld [vmem:[#allocation5 + $0xd0] sm:$0xff]  ;;  %v550_v50 = vld [vmem:[#allocation5 + $0xc0] sm:$0xff] }
 0x131   :  { %561 = vmatpush.msra.mxu0 %v554_v42 }
 0x132   :  { %v326_v55 = vadd.f32 %v325_v52, %v1239_v53  ;;  %v336_v56 = vmul.f32 %v1239_v53, %v1239_v53 }
 0x133   :  { %562 = vmatpush.msra.mxu0 %v553_v43 }
 0x134   :  { %v327_v57 = vrot.slane %v326_v55, 4  ;;  %v339_v58 = vadd.f32 %v338_v54, %v336_v56  ;;  %v390_v56 = vld [vmem:[%s1348_s4] sm:$0x1] }
 0x135   :  { %563 = vmatpush.msra.mxu0 %v552_v46 }
 0x136   :  { %v340_v59 = vrot.slane %v339_v58, 4  ;;  %v328_v60 = vadd.f32 %v327_v57, %v326_v55 }
 0x137   :  { %564 = vmatpush.msra.mxu0 %v551_v48  ;;  %v630_v48 = vld [vmem:[#allocation5 + $0x168] sm:$0xff] }
 0x138   :  { %v329_v61 = vrot.slane %v328_v60, 2  ;;  %v341_v62 = vadd.f32 %v340_v59, %v339_v58 }
 0x139   :  { %565 = vmatpush.msra.mxu0 %v550_v50  ;;  %v629_v50 = vld [vmem:[#allocation5 + $0x160] sm:$0xff] }
 0x13a   :  { %v330_v63 = vadd.f32 %v329_v61, %v328_v60  ;;  %v342_v3 = vrot.slane %v341_v62, 2  ;;  %v403_v60 = vld [vmem:[%s1349_s5] sm:$0x1] }
 0x13c   :  { %v331_v4 = vrot.slane %v330_v63, 1  ;;  %v343_v7 = vadd.f32 %v342_v3, %v341_v62  ;;  %v549_v62 = vld [vmem:[#allocation5 + $0xb8] sm:$0xff]  ;;  %v547_v3 = vld [vmem:[#allocation5 + $0xa8] sm:$0xff] }
 0x13d   :  { %566 = vmatpush.msra.mxu0 %v549_v62 }
 0x13e   :  { %v332_v8 = vadd.f32 %v331_v4, %v330_v63  ;;  %v344_v13 = vrot.slane %v343_v7, 1  ;;  %v548_v63 = vld [vmem:[#allocation5 + $0xb0] sm:$0xff]  ;;  %v546_v4 = vld [vmem:[#allocation5 + $0xa0] sm:$0xff] }
 0x13f   :  { %567 = vmatpush.msra.mxu0 %v548_v63 }
 0x140   :  { %362 = vmatmul.f32.vlgmr.msra.gmra.mxu1 %v332_v8  ;;  %v345_v20 = vadd.f32 %v344_v13, %v343_v7  ;;  %v545_v7 = vld [vmem:[#allocation5 + $0x98] sm:$0xff]  ;;  %v544_v8 = vld [vmem:[#allocation5 + $0x90] sm:$0xff]  ;;  %v543_v13 = vld [vmem:[#allocation5 + $0x88] sm:$0xff] }
 0x141   :  { %448 = vmatpush.msra.mxu1 %v1247_v21  ;;  %568 = vmatpush.msra.mxu0 %v547_v3 }
 0x142   :  { %383 = vmatmul.f32.vlgmr.msrb.gmra.mxu2 %v345_v20  ;;  %v542_v20 = vld [vmem:[#allocation5 + $0x80] sm:$0xff] }
 0x143   :  { %569 = vmatpush.msra.mxu0 %v546_v4 }
 0x145   :  { %570 = vmatpush.msra.mxu0 %v545_v7 }
 0x147   :  { %571 = vmatpush.msra.mxu0 %v544_v8 }
 0x149   :  { %572 = vmatpush.msra.mxu0 %v543_v13 }
 0x14b   :  { %573 = vmatpush.msra.mxu0 %v542_v20 }
 0x14d   :  { %709 = vmatpush.msrb.mxu0 %v1115_v0 }
 0x14f   :  { %710 = vmatpush.msrb.mxu0 %v1122_v1 }
 0x151   :  { %711 = vmatpush.msrb.mxu0 %v1129_v2 }
 0x153   :  { %712 = vmatpush.msrb.mxu0 %v1136_v9 }
 0x155   :  { %713 = vmatpush.msrb.mxu0 %v1143_v10 }
 0x157   :  { %714 = vmatpush.msrb.mxu0 %v1150_v11 }
 0x159   :  { %715 = vmatpush.msrb.mxu0 %v1157_v12 }
 0x15b   :  { %716 = vmatpush.msrb.mxu0 %v1164_v14 }
 0x15d   :  { %717 = vmatpush.msrb.mxu0 %v1171_v15 }
 0x15f   :  { %718 = vmatpush.msrb.mxu0 %v1178_v16 }
 0x161   :  { %719 = vmatpush.msrb.mxu0 %v1185_v17 }
 0x163   :  { %720 = vmatpush.msrb.mxu0 %v1192_v22 }
 0x165   :  { %721 = vmatpush.msrb.mxu0 %v1197_v23 }
 0x167   :  { %722 = vmatpush.msrb.mxu0 %v1204_v25 }
 0x169   :  { %723 = vmatpush.msrb.mxu0 %v1211_v26 }
 0x16b   :  { %724 = vmatpush.msrb.mxu0 %v1218_v27 }
 0x1bd   :  { %v363_v24 = vpop.f32.mrf.mxu1 }
 0x1be   :  { %v366_v28 = vmul.f32 0.001953125, %v363_v24 }
 0x1c0   :  { %v388_v30 = vmul.f32 %v366_v28, %v366_v28 }
 0x1c5   :  { %v384_v29 = vpop.f32.mrf.mxu2 }
 0x1c6   :  { %v387_v33 = vmul.f32 0.001953125, %v384_v29 }
 0x1c8   :  { %v389_v34 = vsub.f32 %v387_v33, %v388_v30 }
 0x1ca   :  { %v391_v37 = vadd.f32 1e-05, %v389_v34 }
 0x1cc   :  { %861 = vrsqrt.f32 %v391_v37  ;;  %vm398_vm2 = vweird.f32 %v391_v37 }
 0x1d2   :  { %v862_v47 = vpop.eup %861 }
 0x1d3   :  { %v393_v49 = vmul.f32 %v862_v47, %v391_v37  ;;  %vm399_vm1 = vweird.f32 %v862_v47 }
 0x1d4   :  { %vm400_vm3 = vmor %vm398_vm2, %vm399_vm1 }
 0x1d5   :  { %v394_v51 = vmul.f32 %v862_v47, %v393_v49  ;;  %v540_v49 = vld [vmem:[#allocation5 + $0x78] sm:$0xff] }
 0x1d7   :  { %v395_v52 = vmul.f32 0.5, %v394_v51  ;;  %v539_v51 = vld [vmem:[#allocation5 + $0x70] sm:$0xff] }
 0x1d9   :  { %v396_v54 = vsub.f32 1.5, %v395_v52  ;;  %v628_v52 = vld [vmem:[#allocation5 + $0x158] sm:$0xff] }
 0x1db   :  { %v397_v55 = vmul.f32 %v862_v47, %v396_v54  ;;  %v538_v54 = vld [vmem:[#allocation5 + $0x68] sm:$0xff] }
 0x1dd   :  { %v401_v57 = vsel %vm400_vm3, %v862_v47, %v397_v55  ;;  %v627_v55 = vld [vmem:[#allocation5 + $0x150] sm:$0xff] }
 0x1de   :  { %v402_v58 = vmul.f32 %v401_v57, %v390_v56  ;;  %v537_v56 = vld [vmem:[#allocation5 + $0x60] sm:$0xff]  ;;  %v626_v57 = vld [vmem:[#allocation5 + $0x148] sm:$0xff] }
 0x1e0   :  { %844 = vmatmul.msk.f32.vlgmr.msrb.gmra.mxu1 %vm406_vm4, %v402_v58  ;;  %v404_v59 = vmul.f32 %v402_v58, %v366_v28  ;;  %v625_v58 = vld [vmem:[#allocation5 + $0x140] sm:$0xff] }
 0x1e2   :  { %v405_v61 = vsub.f32 %v403_v60, %v404_v59  ;;  %v533_v59 = vld [vmem:[#allocation5 + $0x40] sm:$0xff] }
 0x1e8   :  { %845 = vmatmul.msk.f32.vlgmr.msra.gmra.mxu1 %vm406_vm4, %v405_v61 }
 0x25d   :  { %v427_v24 = vpop.f32.mrf.mxu1 }
 0x25e   :  { %v453_v28 = vperm.slane %v427_v24, 0 }
 0x260   :  { %v454_v30 = vmul.f32 %v453_v28, %v1226_v39  ;;  %v457_v33 = vmul.f32 %v453_v28, %v1239_v53  ;;  %v456_v35 = vmul.f32 %v453_v28, %v1228_v40  ;;  %v455_v42 = vmul.f32 %v453_v28, %v1224_v38  ;;  %v632_v40 = vld [vmem:[#allocation5 + $0x178] sm:$0xff]  ;;  %v631_v53 = vld [vmem:[#allocation5 + $0x170] sm:$0xff] }
 0x261   :  { %633 = vmatpush.msra.mxu2 %v632_v40 }
 0x263   :  { %634 = vmatpush.msra.mxu2 %v631_v53 }
 0x265   :  { %v450_v29 = vpop.f32.mrf.mxu1  ;;  %635 = vmatpush.msra.mxu2 %v630_v48 }
 0x266   :  { %v458_v34 = vperm.slane %v450_v29, 0 }
 0x267   :  { %636 = vmatpush.msra.mxu2 %v629_v50 }
 0x268   :  { %v462_v36 = vadd.f32 %v458_v34, %v457_v33  ;;  %v459_v37 = vadd.f32 %v458_v34, %v454_v30  ;;  %v461_v41 = vadd.f32 %v458_v34, %v456_v35  ;;  %v460_v47 = vadd.f32 %v458_v34, %v455_v42 }
 0x269   :  { %637 = vmatpush.msra.mxu2 %v628_v52 }
 0x26a   :  { %v1278_v43 = vmax.f32 %v462_v36, 0.0  ;;  %v463_v46 = vmax.f32 %v459_v37, 0.0  ;;  %v465_v39 = vmax.f32 %v461_v41, 0.0  ;;  %v464_v38 = vmax.f32 %v460_v47, 0.0 }
 0x26b   :  { %638 = vmatpush.msra.mxu2 %v627_v55 }
 0x26c   :  { %479 = vmatpush.msrb.mxu1 %v1278_v43  ;;  %508 = vmatpush.msra.mxu3 %v1278_v43 }
 0x26d   :  { %574 = vmatmul.f32.vlgmr.msra.gmra.mxu0 %v463_v46  ;;  %639 = vmatpush.msra.mxu2 %v626_v57 }
 0x26e   :  { %480 = vmatpush.msrb.mxu1 %v465_v39  ;;  %509 = vmatpush.msra.mxu3 %v465_v39 }
 0x26f   :  { %789 = vmatpush.msra.mxu0 %v1247_v21  ;;  %640 = vmatpush.msra.mxu2 %v625_v58 }
 0x270   :  { %481 = vmatpush.msrb.mxu1 %v464_v38  ;;  %510 = vmatpush.msra.mxu3 %v464_v38 }
 0x272   :  { %482 = vmatpush.msrb.mxu1 %v463_v46  ;;  %511 = vmatpush.msra.mxu3 %v463_v46 }
 0x273   :  { %846 = vmatmul.msk.f32.vlgmr.msrb.gmra.mxu1 %vm100_vm0, %v1053_v5  ;;  %850 = vmatmul.msk.f32.vlgmr.msra.gmra.mxu3 %vm100_vm0, %v1058_v6  ;;  %v536_v5 = vld [vmem:[#allocation5 + $0x58] sm:$0xff]  ;;  %v535_v6 = vld [vmem:[#allocation5 + $0x50] sm:$0xff] }
 0x274   :  { %587 = vmatpush.msra.mxu1 %v540_v49  ;;  %688 = vmatpush.msrb.mxu3 %v1115_v0  ;;  %v624_v0 = vld [vmem:[#allocation5 + $0x138] sm:$0xff] }
 0x275   :  { %577 = vmatmul.f32.gmra.mxu0 %v464_v38  ;;  %641 = vmatpush.msra.mxu2 %v624_v0 }
 0x276   :  { %588 = vmatpush.msra.mxu1 %v539_v51  ;;  %689 = vmatpush.msrb.mxu3 %v1122_v1  ;;  %v534_v1 = vld [vmem:[#allocation5 + $0x48] sm:$0xff] }
 0x278   :  { %589 = vmatpush.msra.mxu1 %v538_v54  ;;  %690 = vmatpush.msrb.mxu3 %v1129_v2  ;;  %v532_v2 = vld [vmem:[#allocation5 + $0x38] sm:$0xff] }
 0x27a   :  { %590 = vmatpush.msra.mxu1 %v537_v56  ;;  %691 = vmatpush.msrb.mxu3 %v1136_v9  ;;  %v529_v9 = vld [vmem:[#allocation5 + $0x20] sm:$0xff] }
 0x27b   :  { %847 = vmatmul.msk.f32.gmra.mxu1 %vm100_vm0, %v1069_v18  ;;  %851 = vmatmul.msk.f32.gmra.mxu3 %vm100_vm0, %v1074_v19  ;;  %v531_v18 = vld [vmem:[#allocation5 + $0x30] sm:$0xff]  ;;  %v530_v19 = vld [vmem:[#allocation5 + $0x28] sm:$0xff] }
 0x27c   :  { %591 = vmatpush.msra.mxu1 %v536_v5  ;;  %692 = vmatpush.msrb.mxu3 %v1143_v10  ;;  %v526_v10 = vld [vmem:[#allocation5 + $0x8] sm:$0xff] }
 0x27d   :  { %580 = vmatmul.f32.gmra.mxu0 %v465_v39 }
 0x27e   :  { %592 = vmatpush.msra.mxu1 %v535_v6  ;;  %693 = vmatpush.msrb.mxu3 %v1150_v11  ;;  %v621_v11 = vld [vmem:[#allocation5 + $0x120] sm:$0xff] }
 0x280   :  { %593 = vmatpush.msra.mxu1 %v534_v1  ;;  %694 = vmatpush.msrb.mxu3 %v1157_v12  ;;  %v525_v12 = vld [vmem:[#allocation5] sm:$0xff] }
 0x282   :  { %594 = vmatpush.msra.mxu1 %v533_v59  ;;  %695 = vmatpush.msrb.mxu3 %v1164_v14  ;;  %v620_v14 = vld [vmem:[#allocation5 + $0x118] sm:$0xff] }
 0x283   :  { %848 = vmatmul.msk.f32.gmra.mxu1 %vm100_vm0, %v1083_v31  ;;  %852 = vmatmul.msk.f32.gmra.mxu3 %vm100_vm0, %v1088_v32  ;;  %v528_v31 = vld [vmem:[#allocation5 + $0x18] sm:$0xff]  ;;  %v623_v32 = vld [vmem:[#allocation5 + $0x130] sm:$0xff] }
 0x284   :  { %595 = vmatpush.msra.mxu1 %v532_v2  ;;  %696 = vmatpush.msrb.mxu3 %v1171_v15  ;;  %v619_v15 = vld [vmem:[#allocation5 + $0x110] sm:$0xff] }
 0x285   :  { %583 = vmatmul.f32.gmra.mxu0 %v1278_v43  ;;  %642 = vmatpush.msra.mxu2 %v623_v32 }
 0x286   :  { %596 = vmatpush.msra.mxu1 %v531_v18  ;;  %697 = vmatpush.msrb.mxu3 %v1178_v16  ;;  %v618_v16 = vld [vmem:[#allocation5 + $0x108] sm:$0xff] }
 0x288   :  { %597 = vmatpush.msra.mxu1 %v530_v19  ;;  %698 = vmatpush.msrb.mxu3 %v1185_v17  ;;  %v617_v17 = vld [vmem:[#allocation5 + $0x100] sm:$0xff] }
 0x28a   :  { %598 = vmatpush.msra.mxu1 %v529_v9  ;;  %699 = vmatpush.msrb.mxu3 %v1192_v22 }
 0x28b   :  { %849 = vmatmul.msk.f32.gmra.mxu1 %vm100_vm0, %v1097_v44  ;;  %853 = vmatmul.msk.f32.gmra.mxu3 %vm100_vm0, %v1102_v45  ;;  %v527_v44 = vld [vmem:[#allocation5 + $0x10] sm:$0xff]  ;;  %v622_v45 = vld [vmem:[#allocation5 + $0x128] sm:$0xff] }
 0x28c   :  { %700 = vmatpush.msrb.mxu3 %v1197_v23  ;;  %599 = vmatpush.msra.mxu1 %v528_v31 }
 0x28d   :  { %643 = vmatpush.msra.mxu2 %v622_v45 }
 0x28e   :  { %701 = vmatpush.msrb.mxu3 %v1204_v25  ;;  %600 = vmatpush.msra.mxu1 %v527_v44 }
 0x28f   :  { %644 = vmatpush.msra.mxu2 %v621_v11 }
 0x290   :  { %702 = vmatpush.msrb.mxu3 %v1211_v26  ;;  %601 = vmatpush.msra.mxu1 %v526_v10 }
 0x291   :  { %645 = vmatpush.msra.mxu2 %v620_v14 }
 0x292   :  { %703 = vmatpush.msrb.mxu3 %v1218_v27  ;;  %602 = vmatpush.msra.mxu1 %v525_v12 }
 0x293   :  { %646 = vmatpush.msra.mxu2 %v619_v15 }
 0x294   :  { %766 = vmatpush.msra.mxu3 %v1247_v21 }
 0x295   :  { %647 = vmatpush.msra.mxu2 %v618_v16  ;;  %v732_v16 = vld [vmem:[%s1351_s7] sm:$0x1] }
 0x297   :  { %648 = vmatpush.msra.mxu2 %v617_v17 }
 0x2ea   :  { %v575_v63 = vpop.f32.mrf.mxu0 }
 0x2f0   :  { %v484_v22 = vpop.f32.mrf.mxu1 }
 0x2f1   :  { %603 = vmatmul.f32.vlgmr.msra.gmra.mxu1 %v484_v22 }
 0x2f2   :  { %v578_v7 = vpop.f32.mrf.mxu0 }
 0x2f6   :  { %v513_v23 = vpop.f32.mrf.mxu3 }
 0x2f7   :  { %649 = vmatmul.f32.vlgmr.msra.gmra.mxu2 %v513_v23 }
 0x2f8   :  { %v487_v25 = vpop.f32.mrf.mxu1 }
 0x2f9   :  { %606 = vmatmul.f32.gmra.mxu1 %v487_v25  ;;  %v745_v25 = vld [vmem:[%s1352_s8] sm:$0x1] }
 0x2fa   :  { %v581_v20 = vpop.f32.mrf.mxu0 }
 0x2fe   :  { %v516_v26 = vpop.f32.mrf.mxu3 }
 0x2ff   :  { %652 = vmatmul.f32.gmra.mxu2 %v516_v26 }
 0x300   :  { %v490_v27 = vpop.f32.mrf.mxu1 }
 0x301   :  { %609 = vmatmul.f32.gmra.mxu1 %v490_v27 }
 0x302   :  { %v584_v41 = vpop.f32.mrf.mxu0 }
 0x306   :  { %v519_v21 = vpop.f32.mrf.mxu3 }
 0x307   :  { %655 = vmatmul.f32.gmra.mxu2 %v519_v21 }
 0x308   :  { %v493_v60 = vpop.f32.mrf.mxu1 }
 0x309   :  { %612 = vmatmul.f32.gmra.mxu1 %v493_v60 }
 0x30e   :  { %v522_v61 = vpop.f32.mrf.mxu3 }
 0x30f   :  { %658 = vmatmul.f32.gmra.mxu2 %v522_v61 }
 0x36e   :  { %v604_v62 = vpop.f32.mrf.mxu1 }
 0x36f   :  { %v605_v29 = vadd.f32 %v604_v62, %v575_v63 }
 0x376   :  { %v607_v3 = vpop.f32.mrf.mxu1 }
 0x377   :  { %v608_v24 = vadd.f32 %v607_v3, %v578_v7 }
 0x37a   :  { %v650_v4 = vpop.f32.mrf.mxu2 }
 0x37b   :  { %v662_v34 = vadd.f32 %v650_v4, %v605_v29 }
 0x37d   :  { %v675_v42 = vmul.f32 %v662_v34, %v662_v34 }
 0x37e   :  { %v610_v13 = vpop.f32.mrf.mxu1 }
 0x37f   :  { %v611_v30 = vadd.f32 %v610_v13, %v581_v20 }
 0x382   :  { %v653_v8 = vpop.f32.mrf.mxu2 }
 0x383   :  { %v663_v33 = vadd.f32 %v653_v8, %v608_v24 }
 0x385   :  { %v676_v37 = vmul.f32 %v663_v33, %v663_v33  ;;  %v666_v43 = vadd.f32 %v663_v33, %v662_v34 }
 0x386   :  { %v613_v36 = vpop.f32.mrf.mxu1 }
 0x387   :  { %v614_v46 = vadd.f32 %v613_v36, %v584_v41  ;;  %v679_v40 = vadd.f32 %v676_v37, %v675_v42 }
 0x38a   :  { %v656_v28 = vpop.f32.mrf.mxu2 }
 0x38b   :  { %v664_v35 = vadd.f32 %v656_v28, %v611_v30  ;;  %v865_v28 = vld [vmem:[%s1344_s0] sm:$0xff]  ;;  %v866_v30 = vld [vmem:[%s1344_s0 + $0x8] sm:$0xff] }
 0x38d   :  { %v677_v47 = vmul.f32 %v664_v35, %v664_v35  ;;  %v667_v53 = vadd.f32 %v666_v43, %v664_v35 }
 0x38f   :  { %v680_v48 = vadd.f32 %v679_v40, %v677_v47 }
 0x392   :  { %v659_v39 = vpop.f32.mrf.mxu2 }
 0x393   :  { %v665_v38 = vadd.f32 %v659_v39, %v614_v46 }
 0x395   :  { %v668_v49 = vadd.f32 %v667_v53, %v665_v38  ;;  %v678_v50 = vmul.f32 %v665_v38, %v665_v38 }
 0x397   :  { %v669_v51 = vrot.slane %v668_v49, 4  ;;  %v681_v52 = vadd.f32 %v680_v48, %v678_v50 }
 0x399   :  { %v670_v54 = vadd.f32 %v669_v51, %v668_v49  ;;  %v682_v55 = vrot.slane %v681_v52, 4 }
 0x39b   :  { %v671_v56 = vrot.slane %v670_v54, 2  ;;  %v683_v57 = vadd.f32 %v682_v55, %v681_v52 }
 0x39d   :  { %v672_v5 = vadd.f32 %v671_v56, %v670_v54  ;;  %v684_v58 = vrot.slane %v683_v57, 2 }
 0x39f   :  { %v673_v6 = vrot.slane %v672_v5, 1  ;;  %v685_v0 = vadd.f32 %v684_v58, %v683_v57 }
 0x3a1   :  { %v674_v1 = vadd.f32 %v673_v6, %v672_v5  ;;  %v686_v59 = vrot.slane %v685_v0, 1 }
 0x3a3   :  { %704 = vmatmul.f32.vlgmr.msrb.gmra.mxu3 %v674_v1  ;;  %v687_v2 = vadd.f32 %v686_v59, %v685_v0 }
 0x3a5   :  { %725 = vmatmul.f32.vlgmr.msrb.gmra.mxu0 %v687_v2 }
 0x422   :  { %v726_v18 = vpop.f32.mrf.mxu0 }
 0x423   :  { %v729_v31 = vmul.f32 0.001953125, %v726_v18 }
 0x426   :  { %v705_v19 = vpop.f32.mrf.mxu3 }
 0x427   :  { %v708_v9 = vmul.f32 0.001953125, %v705_v19 }
 0x429   :  { %v730_v32 = vmul.f32 %v708_v9, %v708_v9 }
 0x42b   :  { %v731_v44 = vsub.f32 %v729_v31, %v730_v32 }
 0x42d   :  { %v733_v45 = vadd.f32 1e-05, %v731_v44 }
 0x42f   :  { %863 = vrsqrt.f32 %v733_v45  ;;  %vm740_vm6 = vweird.f32 %v733_v45 }
 0x435   :  { %v864_v10 = vpop.eup %863 }
 0x436   :  { %v735_v11 = vmul.f32 %v864_v10, %v733_v45  ;;  %vm741_vm5 = vweird.f32 %v864_v10 }
 0x437   :  { %vm742_vm7 = vmor %vm740_vm6, %vm741_vm5 }
 0x438   :  { %v736_v12 = vmul.f32 %v864_v10, %v735_v11 }
 0x43a   :  { %v737_v14 = vmul.f32 0.5, %v736_v12 }
 0x43c   :  { %v738_v15 = vsub.f32 1.5, %v737_v14 }
 0x43e   :  { %v739_v17 = vmul.f32 %v864_v10, %v738_v15 }
 0x440   :  { %v743_v22 = vsel %vm742_vm7, %v864_v10, %v739_v17 }
 0x441   :  { %v744_v23 = vmul.f32 %v743_v22, %v732_v16 }
 0x443   :  { %v746_v26 = vmul.f32 %v744_v23, %v708_v9  ;;  %854 = vmatmul.msk.f32.vlgmr.msra.gmra.mxu3 %vm406_vm4, %v744_v23 }
 0x445   :  { %v747_v27 = vsub.f32 %v745_v25, %v746_v26 }
 0x447   :  { %855 = vmatmul.msk.f32.vlgmr.msra.gmra.mxu0 %vm406_vm4, %v747_v27 }
 0x4c4   :  { %v791_v21 = vpop.f32.mrf.mxu0 }
 0x4c5   :  { %v799_v62 = vperm.slane %v791_v21, 0 }
 0x4c6   :  { %v768_v60 = vpop.f32.mrf.mxu3 }
 0x4c7   :  { %v794_v61 = vperm.slane %v768_v60, 0 }
 0x4c9   :  { %v795_v63 = vmul.f32 %v794_v61, %v662_v34  ;;  %v796_v3 = vmul.f32 %v794_v61, %v663_v33  ;;  %v797_v4 = vmul.f32 %v794_v61, %v664_v35  ;;  %v798_v7 = vmul.f32 %v794_v61, %v665_v38  ;;  %v867_v33 = vld [vmem:[%s1344_s0 + $0x10] sm:$0xff]  ;;  %v868_v35 = vld [vmem:[%s1344_s0 + $0x18] sm:$0xff] }
 0x4cb   :  { %v800_v8 = vadd.f32 %v799_v62, %v795_v63  ;;  %v801_v13 = vadd.f32 %v799_v62, %v796_v3  ;;  %v802_v20 = vadd.f32 %v799_v62, %v797_v4  ;;  %v803_v24 = vadd.f32 %v799_v62, %v798_v7 }
 0x4cd   :  { %v804_v29 = vadd.f32 %v865_v28, %v800_v8  ;;  %v805_v36 = vadd.f32 %v866_v30, %v801_v13  ;;  %v806_v34 = vadd.f32 %v867_v33, %v802_v20  ;;  %v807_v37 = vadd.f32 %v868_v35, %v803_v24 }
 0x4cf   :  { %v808_v41 = vmax.f32 %v804_v29, 0.0  ;;  %v809_v42 = vmax.f32 %v805_v36, 0.0  ;;  %v810_v43 = vmax.f32 %v806_v34, 0.0  ;;  %v811_v46 = vmax.f32 %v807_v37, 0.0 }
 0x4d1   :  { %812 = vst [vmem:[#allocation7] sm:$0xff] %v808_v41 }
 0x4d2   :  { %813 = vst [vmem:[#allocation7 + $0x8] sm:$0xff] %v809_v42 }
 0x4d3   :  { %814 = vst [vmem:[#allocation7 + $0x10] sm:$0xff] %v810_v43 }
 0x4d4   :  { %815 = vst [vmem:[#allocation7 + $0x18] sm:$0xff] %v811_v46 }
 0x4d5   :  { %828 = dma.vmem_to_hbm [thread:$0]  %s821_s14, 512, %s823_s17, [#allocation4], %s948_s25, %s948_s25, %s949_s26  }
 0x4d6   :  { %945 = dma.done.wait [#allocation4], 512  }
 0x4d7   :  { %946 = vsyncadd [#allocation4], 4294966784 }
 0x4d8   :  { %833 = vsyncpa [#allocation3], 1 }
 0x4d9   :  { %834 = vsyncpa [#allocation6], 1 }
 0x4da   :  { %835 = vsyncpa [#allocation4], 1 }

</bundles_post_ra>
